<compile_context>
chip_gen: v7x
topology: tpu7x:2x2x1
jax: 0.10.0
libtpu: 0.0.40
codegen_flags: <defaults>
</compile_context>

<pallas_src>
import jax
import jax.numpy as jnp
from jax.experimental import pallas as pl
from jax.experimental.pallas import tpu as pltpu

GAMMA = 0.99


# --------------------------------------------------------------------------
# Kernels
# --------------------------------------------------------------------------
def reward_net_kernel(s_ref, sn_ref, w1_ref, w2_ref, out_ref):
    """Fused forward: r(s) + gamma * h(s_next) - h(s).

    s_ref : [B, D]      state batch (B multiple of 8)
    sn_ref: [B, D]      next-state batch
    w1_ref: [D, Hp]     [rw1 | hw1 | 0-pad]   (Hp = 2H rounded up to 128)
    w2_ref: [8, Hp]     row 0 = [rw2 ; -hw2 ; 0]
                        row 1 = [0 ; gamma*hw2 ; 0]
                        row 2 = [rb1 ; hb1 ; 0]          (layer-1 bias)
                        row 3 = [rw2 ; 0 ; 0]            (reward-only weights)
                        row 4[0] = rb2 + (gamma-1)*hb2   (combine constant)
                        row 5[0] = rb2                   (reward-only constant)
    out   : [B, 1]
    """
    w1 = w1_ref[...]
    b1 = w2_ref[2:3, :]  # [1, Hp] broadcast add

    # Two MXU matmuls against the shared layer-1 slab; bias + ReLU on the VPU.
    hid_s = jnp.maximum(
        jnp.dot(s_ref[...], w1, preferred_element_type=jnp.float32) + b1, 0.0)
    hid_n = jnp.maximum(
        jnp.dot(sn_ref[...], w1, preferred_element_type=jnp.float32) + b1, 0.0)

    # N=1 second layer as VPU multiply + XLU lane reduction (no 1/128-lane MXU).
    rh = jnp.sum(hid_s * w2_ref[0:1, :], axis=-1, keepdims=True)  # r - h
    hn = jnp.sum(hid_n * w2_ref[1:2, :], axis=-1, keepdims=True)  # gamma*h_next

    out_ref[...] = rh + hn + w2_ref[4:5, 0:1]


def reward_only_kernel(s_ref, w1_ref, w2_ref, out_ref):
    """s_next=None branch: r(s) only (uses the same packed slabs)."""
    b1 = w2_ref[2:3, :]
    hid = jnp.maximum(
        jnp.dot(s_ref[...], w1_ref[...], preferred_element_type=jnp.float32) + b1,
        0.0)
    r = jnp.sum(hid * w2_ref[3:4, :], axis=-1, keepdims=True)
    out_ref[...] = r + w2_ref[5:6, 0:1]


# --------------------------------------------------------------------------
# Parameter packing (call ONCE per parameter update, not per forward)
# --------------------------------------------------------------------------
def pack_params(p, gamma=GAMMA):
    """Pack the 8 Linear tensors into 2 lane-padded slabs.

    gamma is folded into the slabs; re-pack if gamma changes.
    """
    D, H = p["rw1"].shape
    two_h = 2 * H
    hp = ((two_h + 127) // 128) * 128  # pad hidden axis to full 128-lane vregs

    # Layer-1 slab: r/h weights side by side, zero-padded to Hp lanes.
    w1 = jnp.concatenate([p["rw1"], p["hw1"]], axis=1)          # [D, 2H]
    slab1 = jnp.pad(w1, ((0, 0), (0, hp - two_h)))               # [D, Hp]

    rw2 = p["rw2"][:, 0]
    hw2 = p["hw2"][:, 0]

    def padrow(v):
        return jnp.pad(v, (0, hp - v.shape[0]))

    zeros = jnp.zeros((hp,), jnp.float32)
    row0 = padrow(jnp.concatenate([rw2, -hw2]))                  # r - h combine
    row1 = padrow(jnp.concatenate([jnp.zeros_like(rw2), gamma * hw2]))
    row2 = padrow(jnp.concatenate([p["rb1"][0], p["hb1"][0]]))   # layer-1 bias
    row3 = padrow(jnp.concatenate([rw2, jnp.zeros_like(hw2)]))   # reward-only w2
    row4 = zeros.at[0].set(p["rb2"][0, 0] + (gamma - 1.0) * p["hb2"][0, 0])
    row5 = zeros.at[0].set(p["rb2"][0, 0])
    slab2 = jnp.stack([row0, row1, row2, row3, row4, row5, zeros, zeros], axis=0)

    return slab1, slab2                                          # [D,Hp], [8,Hp]


# --------------------------------------------------------------------------
# Forward wrapper
# --------------------------------------------------------------------------
def reward_net_forward(s, packed, s_next=None):
    """RewardNet.forward: r(s) + gamma*h(s_next) - h(s), or r(s) if s_next is None.

    `packed` is the (slab1, slab2) pair from pack_params (gamma already folded).
    """
    slab1, slab2 = packed
    B = s.shape[0]
    bp = ((B + 7) // 8) * 8  # f32 sublane tile alignment
    if bp != B:
        s = jnp.pad(s, ((0, bp - B), (0, 0)))
        if s_next is not None:
            s_next = jnp.pad(s_next, ((0, bp - B), (0, 0)))

    vmem = pl.BlockSpec(memory_space=pltpu.MemorySpace.VMEM)
    out_shape = jax.ShapeDtypeStruct((bp, 1), jnp.float32)

    if s_next is None:
        out = pl.pallas_call(
            reward_only_kernel,
            out_shape=out_shape,
            in_specs=[vmem, vmem, vmem],
            out_specs=vmem,
        )(s, slab1, slab2)
    else:
        out = pl.pallas_call(
            reward_net_kernel,
            out_shape=out_shape,
            in_specs=[vmem, vmem, vmem, vmem],
            out_specs=vmem,
        )(s, s_next, slab1, slab2)

    return out if bp == B else out[:B]


# --------------------------------------------------------------------------
# Init + pure-JAX reference
# --------------------------------------------------------------------------
def init_params(key, state_dim, hidden_dim=64):
    """Deterministic init mimicking PyTorch's default Linear init."""
    ks = jax.random.split(key, 8)

    def lin(kw, kb, fan_in, fan_out):
        bound = 1.0 / jnp.sqrt(jnp.float32(fan_in))
        w = jax.random.uniform(kw, (fan_in, fan_out), jnp.float32, -bound, bound)
        b = jax.random.uniform(kb, (1, fan_out), jnp.float32, -bound, bound)
        return w, b

    rw1, rb1 = lin(ks[0], ks[1], state_dim, hidden_dim)
    rw2, rb2 = lin(ks[2], ks[3], hidden_dim, 1)
    hw1, hb1 = lin(ks[4], ks[5], state_dim, hidden_dim)
    hw2, hb2 = lin(ks[6], ks[7], hidden_dim, 1)
    return dict(rw1=rw1, rb1=rb1, rw2=rw2, rb2=rb2,
                hw1=hw1, hb1=hb1, hw2=hw2, hb2=hb2)


def reference_forward(s, s_next, p, gamma=GAMMA):
    def mlp(x, w1, b1, w2, b2):
        return jnp.maximum(x @ w1 + b1, 0.0) @ w2 + b2
    r = mlp(s, p["rw1"], p["rb1"], p["rw2"], p["rb2"])
    if s_next is None:
        return r
    h = mlp(s, p["hw1"], p["hb1"], p["hw2"], p["hb2"])
    h_next = mlp(s_next, p["hw1"], p["hb1"], p["hw2"], p["hb2"])
    return r + gamma * h_next - h


if __name__ == "__main__":
    batch, state_dim, hidden_dim = 8, 16, 32

    key = jax.random.PRNGKey(0)
    k_s, k_sn, k_p = jax.random.split(key, 3)
    s = jax.random.normal(k_s, (batch, state_dim), jnp.float32)
    s_next = jax.random.normal(k_sn, (batch, state_dim), jnp.float32)
    params = init_params(k_p, state_dim, hidden_dim)

    # Pack ONCE (would be re-done after each optimizer step, not per forward).
    packed = pack_params(params, GAMMA)

    # Full TD-style branch.
    out = jax.block_until_ready(reward_net_forward(s, packed, s_next))
    ref = reference_forward(s, s_next, params)
    assert out.shape == (batch, 1)
    assert jnp.allclose(out, ref, atol=1e-5, rtol=1e-5)

    # Reward-only branch (s_next=None).
    out_r = jax.block_until_ready(reward_net_forward(s, packed, None))
    ref_r = reference_forward(s, None, params)
    assert out_r.shape == (batch, 1)
    assert jnp.allclose(out_r, ref_r, atol=1e-5, rtol=1e-5)

    print("KERNEL_OK")
</pallas_src>

<mosaic_0001>
module attributes {stable_mosaic.version = 11 : i64} {
  func.func @reward_net_kernel(%arg0: memref<8x16xf32, #tpu.memory_space<vmem>>, %arg1: memref<8x16xf32, #tpu.memory_space<vmem>>, %arg2: memref<16x128xf32, #tpu.memory_space<vmem>>, %arg3: memref<8x128xf32, #tpu.memory_space<vmem>>, %arg4: memref<8x1xf32, #tpu.memory_space<vmem>>) attributes {dimension_semantics = [], scalar_prefetch = 0 : i64, scratch_operands = 0 : i64, tpu.core_type = #tpu.core_type<tc>} {
    %c0 = arith.constant 0 : index
    %c0_0 = arith.constant 0 : index
    %0 = vector.load %arg2[%c0, %c0_0] : memref<16x128xf32, #tpu.memory_space<vmem>>, vector<16x128xf32>
    %c2 = arith.constant 2 : index
    %c0_1 = arith.constant 0 : index
    %1 = vector.load %arg3[%c2, %c0_1] : memref<8x128xf32, #tpu.memory_space<vmem>>, vector<1x128xf32>
    %c0_2 = arith.constant 0 : index
    %c0_3 = arith.constant 0 : index
    %2 = vector.load %arg0[%c0_2, %c0_3] : memref<8x16xf32, #tpu.memory_space<vmem>>, vector<8x16xf32>
    %cst = arith.constant dense<0.000000e+00> : vector<8x128xf32>
    %3 = tpu.matmul %2, %0, %cst {dimension_numbers = #tpu.dot_dimension_numbers<[1], [0], [0], [1], [0, 0, 1, 1], [], []>} : vector<8x16xf32>, vector<16x128xf32>, vector<8x128xf32> -> vector<8x128xf32>
    %4 = vector.broadcast %1 : vector<1x128xf32> to vector<8x128xf32>
    %5 = arith.addf %3, %4 : vector<8x128xf32>
    %cst_4 = arith.constant 0.000000e+00 : f32
    %6 = vector.broadcast %cst_4 : f32 to vector<8x128xf32>
    %7 = arith.maximumf %5, %6 : vector<8x128xf32>
    %c0_5 = arith.constant 0 : index
    %c0_6 = arith.constant 0 : index
    %8 = vector.load %arg1[%c0_5, %c0_6] : memref<8x16xf32, #tpu.memory_space<vmem>>, vector<8x16xf32>
    %cst_7 = arith.constant dense<0.000000e+00> : vector<8x128xf32>
    %9 = tpu.matmul %8, %0, %cst_7 {dimension_numbers = #tpu.dot_dimension_numbers<[1], [0], [0], [1], [0, 0, 1, 1], [], []>} : vector<8x16xf32>, vector<16x128xf32>, vector<8x128xf32> -> vector<8x128xf32>
    %10 = vector.broadcast %1 : vector<1x128xf32> to vector<8x128xf32>
    %11 = arith.addf %9, %10 : vector<8x128xf32>
    %cst_8 = arith.constant 0.000000e+00 : f32
    %12 = vector.broadcast %cst_8 : f32 to vector<8x128xf32>
    %13 = arith.maximumf %11, %12 : vector<8x128xf32>
    %c0_9 = arith.constant 0 : index
    %c0_10 = arith.constant 0 : index
    %14 = vector.load %arg3[%c0_9, %c0_10] : memref<8x128xf32, #tpu.memory_space<vmem>>, vector<1x128xf32>
    %15 = vector.broadcast %14 : vector<1x128xf32> to vector<8x128xf32>
    %16 = arith.mulf %7, %15 : vector<8x128xf32>
    %cst_11 = arith.constant dense<0.000000e+00> : vector<8xf32>
    %17 = vector.multi_reduction <add>, %16, %cst_11 [1] : vector<8x128xf32> to vector<8xf32>
    %18 = vector.shape_cast %17 : vector<8xf32> to vector<8x1xf32>
    %c1 = arith.constant 1 : index
    %c0_12 = arith.constant 0 : index
    %19 = vector.load %arg3[%c1, %c0_12] : memref<8x128xf32, #tpu.memory_space<vmem>>, vector<1x128xf32>
    %20 = vector.broadcast %19 : vector<1x128xf32> to vector<8x128xf32>
    %21 = arith.mulf %13, %20 : vector<8x128xf32>
    %cst_13 = arith.constant dense<0.000000e+00> : vector<8xf32>
    %22 = vector.multi_reduction <add>, %21, %cst_13 [1] : vector<8x128xf32> to vector<8xf32>
    %23 = vector.shape_cast %22 : vector<8xf32> to vector<8x1xf32>
    %24 = arith.addf %18, %23 : vector<8x1xf32>
    %c4 = arith.constant 4 : index
    %c0_14 = arith.constant 0 : index
    %25 = vector.load %arg3[%c4, %c0_14] : memref<8x128xf32, #tpu.memory_space<vmem>>, vector<1x1xf32>
    %26 = vector.broadcast %25 : vector<1x1xf32> to vector<8x1xf32>
    %27 = arith.addf %24, %26 : vector<8x1xf32>
    %c0_15 = arith.constant 0 : index
    %c0_16 = arith.constant 0 : index
    %28 = vector.load %arg4[%c0_15, %c0_16] : memref<8x1xf32, #tpu.memory_space<vmem>>, vector<8x1xf32>
    tpu.vector_store %arg4[%c0_15, %c0_16], %27 {strides = array<i32>} : memref<8x1xf32, #tpu.memory_space<vmem>>, vector<8x1xf32>,
    return
  }
}

</mosaic_0001>

<bundles_post_ra>
// kernel: tpu_custom_call.1
= control target key start
LH: loop header
LB: loop body
LE: loop exit
PB: predicated region body
PF: predicated region fallthrough
CT: control target
= control target key end

     0   :  { %9 = vsyncpa [#allocation3], 0  ;;  %s437_s0 = inlined_call_operand.hbm [shape: f32[8,16], index: 0, kind: input, shape index: {}]   ;;  %s438_s1 = inlined_call_operand.hbm [shape: f32[8,16], index: 1, kind: input, shape index: {}]   ;;  %s439_s2 = inlined_call_operand.hbm [shape: f32[16,128], index: 2, kind: input, shape index: {}]   ;;  %s440_s3 = inlined_call_operand.vmem [shape: f32[8,128], index: 3, kind: input, shape index: {}]   ;;  %s441_s4 = inlined_call_operand.vmem [shape: f32[8,1], index: 4, kind: output, shape index: {}]  }
   0x1   :  { %10 = vsyncpa [#allocation5], 0  ;;  %s353_s15 = smov [#allocation4]   ;;  %s354_s17 = smov [#allocation2]  }
   0x2   :  { %s27_s16 = sshll.u32 %s353_s15, 4  ;;  %s17_s18 = sshll.u32 %s354_s17, 4  ;;  %s28_s16 = int_to_ptr.vmem [resolvable:$true] %s27_s16  ;;  %s18_s18 = int_to_ptr.vmem [resolvable:$true] %s17_s18 }
   0x3   :  { %s283_s21 = scalar_lea.hbm %s438_s1, 128 }
   0x4   :  { %p284_p0 = scmp.ne.s32.totalorder %s438_s1, %s283_s21  ;;  %p287_p1 = scmp.lt.u32.totalorder %s283_s21, %s438_s1 }
   0x6   :  { %p289_p2 = pnand %p287_p1, %p284_p0 }
   0x8   :  { %292 = shalt.err (!%p289_p2)
}
   0x9   :  { %s293_s26 = scalar_lea.vmem %s28_s16, 128  ;;  %p298_p4 = scmp.lt.s32.totalorder %s28_s16, %s28_s16 }
   0xa   :  { %p294_p3 = scmp.ne.s32.totalorder %s28_s16, %s293_s26  ;;  %p299_p5 = scmp.lt.s32.totalorder %s293_s26, %s293_s26 }
   0xc   :  { %p300_p6 = por %p299_p5, %p298_p4 }
   0xe   :  { %p301_p7 = pnand %p300_p6, %p294_p3 }
  0x10   :  { %304 = shalt.err (!%p301_p7)
}
  0x11   :  { %30 = dma.hbm_to_vmem [thread:$0]  %s438_s1, 128, %s28_s16, [#allocation5]  }
  0x12   :  { %s305_s5 = scalar_lea.hbm %s437_s0, 128 }
  0x13   :  { %p306_p8 = scmp.ne.s32.totalorder %s437_s0, %s305_s5  ;;  %p309_p9 = scmp.lt.u32.totalorder %s305_s5, %s437_s0 }
  0x15   :  { %p311_p10 = pnand %p309_p9, %p306_p8 }
  0x17   :  { %314 = shalt.err (!%p311_p10)
}
  0x18   :  { %s315_s10 = scalar_lea.vmem %s18_s18, 128  ;;  %p320_p12 = scmp.lt.s32.totalorder %s18_s18, %s18_s18 }
  0x19   :  { %p316_p11 = scmp.ne.s32.totalorder %s18_s18, %s315_s10  ;;  %p321_p13 = scmp.lt.s32.totalorder %s315_s10, %s315_s10 }
  0x1b   :  { %p322_p0 = por %p321_p13, %p320_p12 }
  0x1d   :  { %p323_p1 = pnand %p322_p0, %p316_p11 }
  0x1f   :  { %326 = shalt.err (!%p323_p1)
}
  0x20   :  { %20 = dma.hbm_to_vmem [thread:$0]  %s437_s0, 128, %s18_s18, [#allocation3]  }
  0x21   :  { %s355_s12 = smov [#allocation6]   ;;  %s327_s16 = scalar_lea.hbm %s439_s2, 256 }
  0x22   :  { %s36_s13 = sshll.u32 %s355_s12, 4  ;;  %p328_p2 = scmp.ne.s32.totalorder %s439_s2, %s327_s16  ;;  %s37_s13 = int_to_ptr.vmem [resolvable:$true] %s36_s13 }
  0x23   :  { %p331_p3 = scmp.lt.u32.totalorder %s327_s16, %s439_s2 }
  0x25   :  { %p333_p4 = pnand %p331_p3, %p328_p2 }
  0x27   :  { %336 = shalt.err (!%p333_p4)
}
  0x28   :  { %s337_s22 = scalar_lea.vmem %s37_s13, 256  ;;  %p342_p6 = scmp.lt.s32.totalorder %s37_s13, %s37_s13 }
  0x29   :  { %p338_p5 = scmp.ne.s32.totalorder %s37_s13, %s337_s22  ;;  %p343_p7 = scmp.lt.s32.totalorder %s337_s22, %s337_s22 }
  0x2b   :  { %p344_p8 = por %p343_p7, %p342_p6 }
  0x2d   :  { %p345_p9 = pnand %p344_p8, %p338_p5 }
  0x2f   :  { %348 = shalt.err (!%p345_p9)
}
  0x30   :  { %s356_s0 = smov 128   ;;  %s357_s18 = smov 8  }
  0x31   :  { %42 = dma.hbm_to_vmem [thread:$0]  %s439_s2, 256, %s37_s13, [#allocation5], %s356_s0, %s356_s0, %s357_s18  }
  0x32   :  { %349 = dma.done.wait [#allocation3], 128  }
  0x33   :  { %350 = vsyncadd [#allocation3], 4294967168 }
  0x34   :  { %351 = dma.done.wait [#allocation5], 384  }
  0x35   :  { %352 = vsyncadd [#allocation5], 4294966912  ;;  %v358_v0 = vmov 0.0|0.0   ;;  %vm359_vm0 = vmmov 0   ;;  %v360_v1 = vmov 0.0   ;;  %v54_v2 = vld [vmem:[#allocation6] sm:$0xff] }
  0x36   :  { %269 = vmatprep.subr.bf16.mxu0 %v358_v0  ;;  %259 = vmatprep.mubr.msk.f32.mxu0 %vm359_vm0, %v360_v1  ;;  %v55_v3 = vld [vmem:[#allocation6 + $0x8] sm:$0xff]  ;;  %v57_v5 = vld [vmem:[#allocation2] sm:$0xff]  ;;  %vm62_vm1 = vcmask 130048   ;;  %v137_v6 = vld [vmem:[#allocation4] sm:$0xff]  ;;  %vm235_vm2 = vcmask 7168  }
  0x37   :  { %272 = vmatprep.subr.bf16.mxu1 %v358_v0  ;;  %266 = vmatprep.mubr.msk.f32.mxu1 %vm359_vm0, %v360_v1  ;;  %v270_v4 = vpack.c.bf16 %v55_v3, %v54_v2  ;;  %v243_v7 = vld [vmem:[%s440_s3 + $0x2] ss:$0 sm:$0xff]  ;;  %v246_v14 = vld [vmem:[%s440_s3] ss:$0 sm:$0xff]  ;;  %v247_v17 = vld [vmem:[%s440_s3 + $0x1] ss:$0 sm:$0xff] }
  0x38   :  { %v248_v21 = vld [vmem:[%s440_s3 + $0x4] ss:$0 sm:$0xff] }
  0x39   :  { %271 = vmatpush3.bf16.msra.mxu0 %v270_v4  ;;  %274 = vmatpush3.bf16.msra.mxu1 %v270_v4 }
  0x3c   :  { %260 = vmatmul.mubr.msk.f32.vlgmr.msra.gmra.mrb[0].mxu0 %vm62_vm1, %v57_v5  ;;  %267 = vmatmul.mubr.msk.f32.vlgmr.msra.gmra.mrb[0].mxu1 %vm62_vm1, %v137_v6 }
 0x10f   :  { %v132_v8 = vpop.f32.mrb[0].mxu0  ;;  %v207_v9 = vpop.f32.mrb[0].mxu1 }
 0x110   :  { %v133_v10 = vadd.f32 %v243_v7, %v132_v8  ;;  %v261_v11 = vpop.f32.mrb[1].mxu0  ;;  %v208_v12 = vadd.f32 %v243_v7, %v207_v9  ;;  %v268_v13 = vpop.f32.mrb[1].mxu1 }
 0x112   :  { %v136_v15 = vmax.f32 %v133_v10, 0.0  ;;  %v211_v16 = vmax.f32 %v208_v12, 0.0 }
 0x114   :  { %v217_v18 = vmul.f32 %v246_v14, %v136_v15  ;;  %v225_v19 = vmul.f32 %v247_v17, %v211_v16 }
 0x116   :  { %218 = vadd.xlane.f32.xlu0 %v217_v18 }
 0x11a   :  { %226 = vadd.xlane.f32.xlu0 %v225_v19 }
 0x1a3   :  { %v219_v20 = vpop.xlane.xlu0 %218 }
 0x1a7   :  { %v227_v22 = vpop.xlane.xlu0 %226 }
 0x1a8   :  { %v228_v23 = vadd.f32 %v227_v22, %v219_v20 }
 0x1aa   :  { %v234_v24 = vadd.f32 %v248_v21, %v228_v23 }
 0x1ac   :  { %236 = vst.msk [vmem:[%s441_s4] sm:$0xff] %vm235_vm2, %v234_v24 }
 0x1ad   :  { %241 = vsyncpa [#allocation3], 1 }
 0x1ae   :  { %242 = vsyncpa [#allocation5], 1 }

</bundles_post_ra>
